<compile_context>
chip_gen: v5e
topology: v5e:2x2
jax: 0.10.0
libtpu: 0.0.40
codegen_flags: <defaults>
</compile_context>

<pallas_src>
import functools

import jax
import jax.numpy as jnp
from jax.experimental import pallas as pl
from jax.experimental.pallas import tpu as pltpu

LANE = 128       # TPU vreg lane width
SUBLANE = 8      # f32 sublane count


def _round_up(x, m):
    return (x + m - 1) // m * m


# ----------------------------------------------------------------------------
# Kernel: full dueling-Q forward for one batch tile.
#   h   = relu(x  @ W1  + b1)                      [TB, 128] (lanes 64: zero)
#   hb  = relu(h  @ Wb1 + bb1)   (a1 | v1 fused)   [TB, 128] (lanes 64: zero)
#   o2  =       hb @ Wb2 + bb2   (adv | val fused) [TB, 128]
#   out = val + adv - max(adv)   masked to the first L lanes, lane-dense store
# ----------------------------------------------------------------------------
def qnetwork_kernel(x_ref, w1_ref, wb_ref, b_ref, out_ref, *, num_labels,
                    compute_dtype):
    # Static, tile-aligned views into the packed slabs (zero-cost).
    w1 = w1_ref[...]                           # [F, 128]
    wb1 = wb_ref[0:LANE, :]                    # [128, 128]  ad1 | va1
    wb2 = wb_ref[LANE:2 * LANE, :]             # [128, 128]  ad2 | va2 (block diag)
    b1 = b_ref[0:1, :]                         # [1, 128] (f32)
    bb1 = b_ref[1:2, :]
    bb2 = b_ref[2:3, :]

    # Cast on-chip (VPU) so HBM traffic for x stays at the source dtype.
    x = x_ref[...].astype(compute_dtype)       # [TB, F]

    # fc1 + ReLU.  Padded lanes stay exactly 0 (zero weights + zero bias).
    h = jnp.maximum(jnp.dot(x, w1, preferred_element_type=jnp.float32) + b1, 0.0)

    # Fused ad1 | va1 + ReLU (one 128-wide dot instead of two 32-wide ones).
    hb = jnp.maximum(
        jnp.dot(h.astype(compute_dtype), wb1,
                preferred_element_type=jnp.float32) + bb1, 0.0)

    # Fused block-diagonal ad2 | va2: lanes [0, L) = advantage, lane L = value.
    o2 = jnp.dot(hb.astype(compute_dtype), wb2,
                 preferred_element_type=jnp.float32) + bb2

    col = jax.lax.broadcasted_iota(jnp.int32, o2.shape, 1)
    is_adv = col < num_labels
    is_val = col == num_labels
    # max over advantage lanes only (padded / value lanes masked to -inf).
    max_adv = jnp.max(jnp.where(is_adv, o2, -jnp.inf), axis=1, keepdims=True)
    # extract the value lane without a partial-lane slice (XLU reduce).
    val = jnp.sum(jnp.where(is_val, o2, 0.0), axis=1, keepdims=True)

    # Lane-dense store; padded lanes are 0 and sliced off in the wrapper.
    out_ref[...] = jnp.where(is_adv, val + o2 - max_adv, 0.0)


# ----------------------------------------------------------------------------
# Parameter packing: 10 tensors -> 3 lane-dense slabs.
# ----------------------------------------------------------------------------
def pack_params(params, image_size, num_labels, compute_dtype):
    assert num_labels + 1 <= LANE, "num_labels must fit in one 128-lane tile"
    L = num_labels
    F = image_size

    # fc1: [F, 128] (lanes 64..127 zero).  No feature-dim padding needed.
    w1 = (jnp.zeros((F, LANE), jnp.float32)
          .at[:, :64].set(params["w1"])).astype(compute_dtype)

    # ad1 | va1 side-by-side, ad2 | va2 block-diagonal; one [256, 128] slab.
    wb1 = (jnp.zeros((LANE, LANE), jnp.float32)
           .at[:64, :32].set(params["wa1"])
           .at[:64, 32:64].set(params["wv1"]))
    wb2 = (jnp.zeros((LANE, LANE), jnp.float32)
           .at[:32, :L].set(params["wa2"])
           .at[32:64, L:L + 1].set(params["wv2"]))
    wb = jnp.concatenate([wb1, wb2], axis=0).astype(compute_dtype)

    # Biases stay f32 (adds happen on the f32 accumulator).
    b = (jnp.zeros((SUBLANE, LANE), jnp.float32)
         .at[0, :64].set(params["b1"].reshape(-1))
         .at[1, :32].set(params["ba1"].reshape(-1))
         .at[1, 32:64].set(params["bv1"].reshape(-1))
         .at[2, :L].set(params["ba2"].reshape(-1))
         .at[2, L].set(params["bv2"].reshape(-1)[0]))
    return w1, wb, b


# ----------------------------------------------------------------------------
# Wrapper: one pallas_call with a (megacore-parallel) batch grid.
# ----------------------------------------------------------------------------
def qnetwork_forward(x, params, num_labels, *, compute_dtype=jnp.float32,
                     tile_b=256):
    """x: [B, image_size] f32.  compute_dtype=jnp.bfloat16 halves MXU passes on
    v6e/v7x; elementwise math stays f32."""
    assert tile_b % SUBLANE == 0
    B, F = x.shape
    L = num_labels
    w1, wb, b = pack_params(params, F, L, compute_dtype)

    if B <= tile_b:
        # Single full-extent block: no (8,128) divisibility constraint, no pad.
        tb, bp, xp = B, B, x
    else:
        tb = tile_b
        bp = _round_up(B, tb)
        xp = x if bp == B else jnp.zeros((bp, F), x.dtype).at[:B].set(x)

    kernel = functools.partial(qnetwork_kernel, num_labels=L,
                               compute_dtype=compute_dtype)
    out = pl.pallas_call(
        kernel,
        out_shape=jax.ShapeDtypeStruct((bp, LANE), jnp.float32),
        grid_spec=pltpu.PrefetchScalarGridSpec(
            num_scalar_prefetch=0,
            grid=(bp // tb,),
            in_specs=[
                pl.BlockSpec((tb, F), lambda i: (i, 0)),            # x tile
                pl.BlockSpec((F, LANE), lambda i: (0, 0)),           # fc1 slab
                pl.BlockSpec((2 * LANE, LANE), lambda i: (0, 0)),    # fused w slab
                pl.BlockSpec((SUBLANE, LANE), lambda i: (0, 0)),     # bias slab
            ],
            out_specs=pl.BlockSpec((tb, LANE), lambda i: (i, 0)),
        ),
        compiler_params=pltpu.CompilerParams(
            dimension_semantics=("parallel",)),
    )(xp, w1, wb, b)
    return out[:B, :L]


# ----------------------------------------------------------------------------
# Deterministic parameter init (mimics nn.Linear's U(-1/sqrt(in), 1/sqrt(in)));
# weights stored transposed [in, out], biases as [1, out].
# ----------------------------------------------------------------------------
def init_params(key, image_size, num_labels):
    def linear(key, fan_in, fan_out):
        kw, kb = jax.random.split(key)
        bound = 1.0 / jnp.sqrt(jnp.float32(fan_in))
        w = jax.random.uniform(kw, (fan_in, fan_out), jnp.float32, -bound, bound)
        b = jax.random.uniform(kb, (1, fan_out), jnp.float32, -bound, bound)
        return w, b

    k1, k2, k3, k4, k5 = jax.random.split(key, 5)
    w1, b1 = linear(k1, image_size, 64)
    wa1, ba1 = linear(k2, 64, 32)
    wa2, ba2 = linear(k3, 32, num_labels)
    wv1, bv1 = linear(k4, 64, 32)
    wv2, bv2 = linear(k5, 32, 1)
    return dict(w1=w1, b1=b1, wa1=wa1, ba1=ba1, wa2=wa2, ba2=ba2,
                wv1=wv1, bv1=bv1, wv2=wv2, bv2=bv2)


# Pure-JAX reference (matches the PyTorch forward exactly).
def qnetwork_ref(x, p):
    h = jnp.maximum(x @ p["w1"] + p["b1"], 0.0)
    a1 = jnp.maximum(h @ p["wa1"] + p["ba1"], 0.0)
    adv = a1 @ p["wa2"] + p["ba2"]
    v1 = jnp.maximum(h @ p["wv1"] + p["bv1"], 0.0)
    val = v1 @ p["wv2"] + p["bv2"]
    return val + adv - jnp.max(adv, axis=1, keepdims=True)


if __name__ == "__main__":
    image_size = 32   # flattened image feature size
    num_labels = 4    # number of actions / labels

    key = jax.random.PRNGKey(0)
    kx, kp = jax.random.split(key)
    params = init_params(kp, image_size, num_labels)

    # Primary small case: batch=8, single block, f32 path (bit-compatible math).
    x = jax.random.normal(kx, (8, image_size), jnp.float32)
    ref = qnetwork_ref(x, params)
    out = jax.block_until_ready(qnetwork_forward(x, params, num_labels))
    assert out.shape == (8, num_labels)
    assert jnp.allclose(out, ref, atol=1e-5, rtol=1e-5)

    # bf16-matmul / f32-accumulate path (v6e/v7x MXU-friendly), loose tolerance.
    out_bf16 = jax.block_until_ready(
        qnetwork_forward(x, params, num_labels, compute_dtype=jnp.bfloat16))
    assert jnp.allclose(out_bf16, ref, atol=5e-2, rtol=5e-2)

    # Non-multiple-of-8 batch: full-extent block path (no padding anywhere).
    x5 = jax.random.normal(jax.random.fold_in(kx, 1), (5, image_size), jnp.float32)
    out5 = jax.block_until_ready(qnetwork_forward(x5, params, num_labels))
    assert jnp.allclose(out5, qnetwork_ref(x5, params), atol=1e-5, rtol=1e-5)

    # Multi-tile ragged batch: parallel grid path with batch-row padding only.
    xl = jax.random.normal(jax.random.fold_in(kx, 2), (260, image_size), jnp.float32)
    outl = jax.block_until_ready(
        qnetwork_forward(xl, params, num_labels, tile_b=128))
    assert outl.shape == (260, num_labels)
    assert jnp.allclose(outl, qnetwork_ref(xl, params), atol=1e-5, rtol=1e-5)

    print("KERNEL_OK")
</pallas_src>

<mosaic_0001>
module attributes {stable_mosaic.version = 11 : i64} {
  func.func @qnetwork_kernel(%arg0: i32, %arg1: memref<8x32xf32, #tpu.memory_space<vmem>>, %arg2: memref<32x128xf32, #tpu.memory_space<vmem>>, %arg3: memref<256x128xf32, #tpu.memory_space<vmem>>, %arg4: memref<8x128xf32, #tpu.memory_space<vmem>>, %arg5: memref<8x128xf32, #tpu.memory_space<vmem>>) attributes {dimension_semantics = [#tpu.dimension_semantics<parallel>], iteration_bounds = array<i64: 1>, scalar_prefetch = 0 : i64, scratch_operands = 0 : i64, tpu.core_type = #tpu.core_type<tc>, window_params = [{transform_indices = @transform_0, window_bounds = array<i64: 8, 32>}, {pipeline_mode = #tpu.pipeline_mode<synchronous>, transform_indices = @transform_1, window_bounds = array<i64: 32, 128>}, {pipeline_mode = #tpu.pipeline_mode<synchronous>, transform_indices = @transform_2, window_bounds = array<i64: 256, 128>}, {pipeline_mode = #tpu.pipeline_mode<synchronous>, transform_indices = @transform_3, window_bounds = array<i64: 8, 128>}, {transform_indices = @transform_4, window_bounds = array<i64: 8, 128>}]} {
    %c0 = arith.constant 0 : index
    %c0_0 = arith.constant 0 : index
    %0 = vector.load %arg2[%c0, %c0_0] : memref<32x128xf32, #tpu.memory_space<vmem>>, vector<32x128xf32>
    %c0_1 = arith.constant 0 : index
    %c0_2 = arith.constant 0 : index
    %1 = vector.load %arg3[%c0_1, %c0_2] : memref<256x128xf32, #tpu.memory_space<vmem>>, vector<128x128xf32>
    %c128 = arith.constant 128 : index
    %c0_3 = arith.constant 0 : index
    %2 = vector.load %arg3[%c128, %c0_3] : memref<256x128xf32, #tpu.memory_space<vmem>>, vector<128x128xf32>
    %c0_4 = arith.constant 0 : index
    %c0_5 = arith.constant 0 : index
    %3 = vector.load %arg4[%c0_4, %c0_5] : memref<8x128xf32, #tpu.memory_space<vmem>>, vector<1x128xf32>
    %c1 = arith.constant 1 : index
    %c0_6 = arith.constant 0 : index
    %4 = vector.load %arg4[%c1, %c0_6] : memref<8x128xf32, #tpu.memory_space<vmem>>, vector<1x128xf32>
    %c2 = arith.constant 2 : index
    %c0_7 = arith.constant 0 : index
    %5 = vector.load %arg4[%c2, %c0_7] : memref<8x128xf32, #tpu.memory_space<vmem>>, vector<1x128xf32>
    %c0_8 = arith.constant 0 : index
    %c0_9 = arith.constant 0 : index
    %6 = vector.load %arg1[%c0_8, %c0_9] : memref<8x32xf32, #tpu.memory_space<vmem>>, vector<8x32xf32>
    %cst = arith.constant dense<0.000000e+00> : vector<8x128xf32>
    %7 = tpu.matmul %6, %0, %cst {dimension_numbers = #tpu.dot_dimension_numbers<[1], [0], [0], [1], [0, 0, 1, 1], [], []>} : vector<8x32xf32>, vector<32x128xf32>, vector<8x128xf32> -> vector<8x128xf32>
    %8 = vector.broadcast %3 : vector<1x128xf32> to vector<8x128xf32>
    %9 = arith.addf %7, %8 : vector<8x128xf32>
    %cst_10 = arith.constant 0.000000e+00 : f32
    %10 = vector.broadcast %cst_10 : f32 to vector<8x128xf32>
    %11 = arith.maximumf %9, %10 : vector<8x128xf32>
    %cst_11 = arith.constant dense<0.000000e+00> : vector<8x128xf32>
    %12 = tpu.matmul %11, %1, %cst_11 {dimension_numbers = #tpu.dot_dimension_numbers<[1], [0], [0], [1], [0, 0, 1, 1], [], []>} : vector<8x128xf32>, vector<128x128xf32>, vector<8x128xf32> -> vector<8x128xf32>
    %13 = vector.broadcast %4 : vector<1x128xf32> to vector<8x128xf32>
    %14 = arith.addf %12, %13 : vector<8x128xf32>
    %cst_12 = arith.constant 0.000000e+00 : f32
    %15 = vector.broadcast %cst_12 : f32 to vector<8x128xf32>
    %16 = arith.maximumf %14, %15 : vector<8x128xf32>
    %cst_13 = arith.constant dense<0.000000e+00> : vector<8x128xf32>
    %17 = tpu.matmul %16, %2, %cst_13 {dimension_numbers = #tpu.dot_dimension_numbers<[1], [0], [0], [1], [0, 0, 1, 1], [], []>} : vector<8x128xf32>, vector<128x128xf32>, vector<8x128xf32> -> vector<8x128xf32>
    %18 = vector.broadcast %5 : vector<1x128xf32> to vector<8x128xf32>
    %19 = arith.addf %17, %18 : vector<8x128xf32>
    %20 = tpu.iota {dimensions = array<i32: 1>} : vector<8x128xi32>
    %c4_i32 = arith.constant 4 : i32
    %21 = vector.broadcast %c4_i32 : i32 to vector<8x128xi32>
    %22 = arith.cmpi slt, %20, %21 : vector<8x128xi32>
    %c4_i32_14 = arith.constant 4 : i32
    %23 = vector.broadcast %c4_i32_14 : i32 to vector<8x128xi32>
    %24 = arith.cmpi eq, %20, %23 : vector<8x128xi32>
    %cst_15 = arith.constant 0xFF800000 : f32
    %25 = vector.broadcast %cst_15 : f32 to vector<8x128xf32>
    %26 = arith.select %22, %19, %25 : vector<8x128xi1>, vector<8x128xf32>
    %cst_16 = arith.constant dense<0xFF800000> : vector<8xf32>
    %27 = vector.multi_reduction <maximumf>, %26, %cst_16 [1] : vector<8x128xf32> to vector<8xf32>
    %28 = vector.shape_cast %27 : vector<8xf32> to vector<8x1xf32>
    %cst_17 = arith.constant 0.000000e+00 : f32
    %29 = vector.broadcast %cst_17 : f32 to vector<8x128xf32>
    %30 = arith.select %24, %19, %29 : vector<8x128xi1>, vector<8x128xf32>
    %cst_18 = arith.constant dense<0.000000e+00> : vector<8xf32>
    %31 = vector.multi_reduction <add>, %30, %cst_18 [1] : vector<8x128xf32> to vector<8xf32>
    %32 = vector.shape_cast %31 : vector<8xf32> to vector<8x1xf32>
    %33 = vector.broadcast %32 : vector<8x1xf32> to vector<8x128xf32>
    %34 = arith.addf %33, %19 : vector<8x128xf32>
    %35 = vector.broadcast %28 : vector<8x1xf32> to vector<8x128xf32>
    %36 = arith.subf %34, %35 : vector<8x128xf32>
    %cst_19 = arith.constant 0.000000e+00 : f32
    %37 = vector.broadcast %cst_19 : f32 to vector<8x128xf32>
    %38 = arith.select %22, %36, %37 : vector<8x128xi1>, vector<8x128xf32>
    %c0_20 = arith.constant 0 : index
    %c0_21 = arith.constant 0 : index
    %39 = vector.load %arg5[%c0_20, %c0_21] : memref<8x128xf32, #tpu.memory_space<vmem>>, vector<8x128xf32>
    tpu.vector_store %arg5[%c0_20, %c0_21], %38 {strides = array<i32>} : memref<8x128xf32, #tpu.memory_space<vmem>>, vector<8x128xf32>,
    return
  }
  func.func @transform_0(%arg0: i32) -> (i32, i32) {
    %c0_i32 = arith.constant 0 : i32
    %c0_i32_0 = arith.constant 0 : i32
    return %arg0, %c0_i32 : i32, i32
  }
  func.func @transform_1(%arg0: i32) -> (i32, i32) {
    %c0_i32 = arith.constant 0 : i32
    %c0_i32_0 = arith.constant 0 : i32
    %c0_i32_1 = arith.constant 0 : i32
    return %c0_i32, %c0_i32_0 : i32, i32
  }
  func.func @transform_2(%arg0: i32) -> (i32, i32) {
    %c0_i32 = arith.constant 0 : i32
    %c0_i32_0 = arith.constant 0 : i32
    %c0_i32_1 = arith.constant 0 : i32
    return %c0_i32, %c0_i32_0 : i32, i32
  }
  func.func @transform_3(%arg0: i32) -> (i32, i32) {
    %c0_i32 = arith.constant 0 : i32
    %c0_i32_0 = arith.constant 0 : i32
    %c0_i32_1 = arith.constant 0 : i32
    return %c0_i32, %c0_i32_0 : i32, i32
  }
  func.func @transform_4(%arg0: i32) -> (i32, i32) {
    %c0_i32 = arith.constant 0 : i32
    %c0_i32_0 = arith.constant 0 : i32
    return %arg0, %c0_i32 : i32, i32
  }
}

</mosaic_0001>

<bundles_post_ra>
// kernel: tpu_custom_call.1
= control target key start
LH: loop header
LB: loop body
LE: loop exit
PB: predicated region body
PF: predicated region fallthrough
CT: control target
= control target key end

     0   :  { %9 = vsyncpa [#allocation3], 0  ;;  %s405_s0 = inlined_call_operand.hbm [shape: f32[8,32], index: 0, kind: input, shape index: {}]   ;;  %s406_s1 = inlined_call_operand.hbm [shape: f32[32,128], index: 1, kind: input, shape index: {}]   ;;  %s407_s2 = inlined_call_operand.hbm [shape: f32[256,128], index: 2, kind: input, shape index: {}]   ;;  %s408_s3 = inlined_call_operand.hbm [shape: f32[8,128], index: 3, kind: input, shape index: {}]   ;;  %s409_s4 = inlined_call_operand.hbm [shape: f32[8,128], index: 4, kind: output, shape index: {}]  }
   0x1   :  { %10 = vsyncpa [#allocation6], 0 }
   0x2   :  { %11 = vsyncpa [#allocation9], 0  ;;  %s28_s17 = sshll.u32 %s406_s1, 4  ;;  %s29_s17 = int_to_ptr.hbm [resolvable:$true] %s28_s17 }
   0x3   :  { %12 = vsyncpa [#allocation4], 0  ;;  %s358_s18 = smov [#allocation5]   ;;  %s18_s22 = sshll.u32 %s405_s0, 4  ;;  %s19_s22 = int_to_ptr.hbm [resolvable:$true] %s18_s22 }
   0x4   :  { %s30_s19 = sshll.u32 %s358_s18, 4  ;;  %s359_s23 = smov 128   ;;  %s31_s19 = int_to_ptr.vmem [resolvable:$true] %s30_s19 }
   0x5   :  { %s360_s24 = smov 8   ;;  %s361_s25 = smov [#allocation2]  }
   0x6   :  { %36 = dma.hbm_to_vmem [thread:$0]  %s29_s17, 512, %s31_s19, [#allocation6], %s359_s23, %s359_s23, %s360_s24  }
   0x7   :  { %s20_s26 = sshll.u32 %s361_s25, 4  ;;  %s41_s29 = sshll.u32 %s407_s2, 4  ;;  %s21_s26 = int_to_ptr.vmem [resolvable:$true] %s20_s26  ;;  %s42_s29 = int_to_ptr.hbm [resolvable:$true] %s41_s29 }
   0x8   :  { %23 = dma.hbm_to_vmem [thread:$0]  %s19_s22, 128, %s21_s26, [#allocation3]  }
   0x9   :  { %s55_s5 = sshll.u32 %s408_s3, 4  ;;  %s362_s6 = smov [#allocation7]   ;;  %s56_s5 = int_to_ptr.hbm [resolvable:$true] %s55_s5 }
   0xa   :  { %s43_s7 = sshll.u32 %s362_s6, 4  ;;  %s363_s0 = smov [#allocation8]   ;;  %s44_s7 = int_to_ptr.vmem [resolvable:$true] %s43_s7 }
   0xb   :  { %49 = dma.hbm_to_vmem [thread:$0]  %s42_s29, 4096, %s44_s7, [#allocation6], %s359_s23, %s359_s23, %s360_s24  }
   0xc   :  { %s57_s8 = sshll.u32 %s363_s0, 4  ;;  %s58_s8 = int_to_ptr.vmem [resolvable:$true] %s57_s8 }
   0xd   :  { %60 = dma.hbm_to_vmem [thread:$0]  %s56_s5, 128, %s58_s8, [#allocation9]  }
   0xe   :  { %350 = dma.done.wait [#allocation3], 128  }
   0xf   :  { %351 = vsyncadd [#allocation3], 4294967168 }
  0x10   :  { %352 = dma.done.wait [#allocation6], 4608  }
  0x11   :  { %353 = vsyncadd [#allocation6], 4294962688 }
  0x12   :  { %354 = dma.done.wait [#allocation9], 128  }
  0x13   :  { %355 = vsyncadd [#allocation9], 4294967168  ;;  %v80_v0 = vld [vmem:[#allocation5 + $0x18] sm:$0xff]  ;;  %v79_v1 = vld [vmem:[#allocation5 + $0x10] sm:$0xff]  ;;  %vm118_vm0 = vcmask 261120   ;;  %v186_v45 = vlaneseq  ;;  %s364_s2 = smov [#allocation10]  }
  0x14   :  { %134 = vmatpush.msra.mxu0 %v80_v0  ;;  %v96_v2 = vld [vmem:[#allocation7 + $0x78] sm:$0xff]  ;;  %v78_v3 = vld [vmem:[#allocation5 + $0x8] sm:$0xff]  ;;  %v95_v4 = vld [vmem:[#allocation7 + $0x70] sm:$0xff]  ;;  %s205_s3 = sshll.u32 %s364_s2, 4  ;;  %s207_s11 = sshll.u32 %s409_s4, 4  ;;  %s206_s3 = int_to_ptr.vmem [resolvable:$true] %s205_s3  ;;  %s208_s11 = int_to_ptr.hbm [resolvable:$true] %s207_s11 }
  0x15   :  { %144 = vmatpush.msra.mxu1 %v96_v2  ;;  %v94_v5 = vld [vmem:[#allocation7 + $0x68] sm:$0xff]  ;;  %v77_v6 = vld [vmem:[#allocation5] sm:$0xff]  ;;  %v116_v7 = vld [vmem:[#allocation2] sm:$0xff]  ;;  %v187_v46 = vand.u32 127, %v186_v45 }
  0x16   :  { %135 = vmatpush.msra.mxu0 %v79_v1  ;;  %v93_v8 = vld [vmem:[#allocation7 + $0x60] sm:$0xff]  ;;  %v92_v9 = vld [vmem:[#allocation7 + $0x58] sm:$0xff]  ;;  %v91_v10 = vld [vmem:[#allocation7 + $0x50] sm:$0xff] }
  0x17   :  { %145 = vmatpush.msra.mxu1 %v95_v4  ;;  %v90_v11 = vld [vmem:[#allocation7 + $0x48] sm:$0xff]  ;;  %v89_v12 = vld [vmem:[#allocation7 + $0x40] sm:$0xff]  ;;  %v88_v13 = vld [vmem:[#allocation7 + $0x38] sm:$0xff]  ;;  %vm189_vm1 = vcmp.eq.s32.totalorder %v187_v46, 4  ;;  %vm188_vm2 = vcmp.lt.s32.totalorder %v187_v46, 4 }
  0x18   :  { %136 = vmatpush.msra.mxu0 %v78_v3  ;;  %v87_v14 = vld [vmem:[#allocation7 + $0x30] sm:$0xff]  ;;  %v86_v15 = vld [vmem:[#allocation7 + $0x28] sm:$0xff]  ;;  %v85_v16 = vld [vmem:[#allocation7 + $0x20] sm:$0xff] }
  0x19   :  { %146 = vmatpush.msra.mxu1 %v94_v5  ;;  %v84_v17 = vld [vmem:[#allocation7 + $0x18] sm:$0xff]  ;;  %v83_v18 = vld [vmem:[#allocation7 + $0x10] sm:$0xff]  ;;  %v82_v19 = vld [vmem:[#allocation7 + $0x8] sm:$0xff] }
  0x1a   :  { %137 = vmatpush.msra.mxu0 %v77_v6  ;;  %v81_v20 = vld [vmem:[#allocation7] sm:$0xff]  ;;  %v112_v21 = vld [vmem:[#allocation7 + $0xf8] sm:$0xff]  ;;  %v111_v22 = vld [vmem:[#allocation7 + $0xf0] sm:$0xff] }
  0x1b   :  { %219 = vmatmul.msk.f32.vlgmr.msra.gmra.mxu0 %vm118_vm0, %v116_v7  ;;  %147 = vmatpush.msra.mxu1 %v93_v8  ;;  %v110_v23 = vld [vmem:[#allocation7 + $0xe8] sm:$0xff]  ;;  %v109_v24 = vld [vmem:[#allocation7 + $0xe0] sm:$0xff]  ;;  %v108_v25 = vld [vmem:[#allocation7 + $0xd8] sm:$0xff] }
  0x1c   :  { %166 = vmatpush.msra.mxu2 %v112_v21  ;;  %v107_v26 = vld [vmem:[#allocation7 + $0xd0] sm:$0xff]  ;;  %v106_v27 = vld [vmem:[#allocation7 + $0xc8] sm:$0xff]  ;;  %v105_v28 = vld [vmem:[#allocation7 + $0xc0] sm:$0xff] }
  0x1d   :  { %148 = vmatpush.msra.mxu1 %v92_v9  ;;  %v104_v29 = vld [vmem:[#allocation7 + $0xb8] sm:$0xff]  ;;  %v103_v30 = vld [vmem:[#allocation7 + $0xb0] sm:$0xff]  ;;  %v102_v31 = vld [vmem:[#allocation7 + $0xa8] sm:$0xff] }
  0x1e   :  { %167 = vmatpush.msra.mxu2 %v111_v22  ;;  %v101_v32 = vld [vmem:[#allocation7 + $0xa0] sm:$0xff]  ;;  %v100_v33 = vld [vmem:[#allocation7 + $0x98] sm:$0xff]  ;;  %v99_v38 = vld [vmem:[#allocation7 + $0x90] sm:$0xff] }
  0x1f   :  { %149 = vmatpush.msra.mxu1 %v91_v10  ;;  %v227_v34 = vld [vmem:[#allocation8] ss:$0 sm:$0xff]  ;;  %v98_v39 = vld [vmem:[#allocation7 + $0x88] sm:$0xff]  ;;  %v228_v41 = vld [vmem:[#allocation8 + $0x1] ss:$0 sm:$0xff] }
  0x20   :  { %168 = vmatpush.msra.mxu2 %v110_v23  ;;  %v97_v40 = vld [vmem:[#allocation7 + $0x80] sm:$0xff] }
  0x21   :  { %150 = vmatpush.msra.mxu1 %v90_v11  ;;  %v229_v47 = vld [vmem:[#allocation8 + $0x2] ss:$0 sm:$0xff] }
  0x22   :  { %169 = vmatpush.msra.mxu2 %v109_v24 }
  0x23   :  { %151 = vmatpush.msra.mxu1 %v89_v12 }
  0x24   :  { %170 = vmatpush.msra.mxu2 %v108_v25 }
  0x25   :  { %152 = vmatpush.msra.mxu1 %v88_v13 }
  0x26   :  { %171 = vmatpush.msra.mxu2 %v107_v26 }
  0x27   :  { %153 = vmatpush.msra.mxu1 %v87_v14 }
  0x28   :  { %172 = vmatpush.msra.mxu2 %v106_v27 }
  0x29   :  { %154 = vmatpush.msra.mxu1 %v86_v15 }
  0x2a   :  { %173 = vmatpush.msra.mxu2 %v105_v28 }
  0x2b   :  { %155 = vmatpush.msra.mxu1 %v85_v16 }
  0x2c   :  { %174 = vmatpush.msra.mxu2 %v104_v29 }
  0x2d   :  { %156 = vmatpush.msra.mxu1 %v84_v17 }
  0x2e   :  { %175 = vmatpush.msra.mxu2 %v103_v30 }
  0x2f   :  { %157 = vmatpush.msra.mxu1 %v83_v18 }
  0x30   :  { %176 = vmatpush.msra.mxu2 %v102_v31 }
  0x31   :  { %158 = vmatpush.msra.mxu1 %v82_v19 }
  0x32   :  { %177 = vmatpush.msra.mxu2 %v101_v32 }
  0x33   :  { %159 = vmatpush.msra.mxu1 %v81_v20 }
  0x34   :  { %178 = vmatpush.msra.mxu2 %v100_v33 }
  0x36   :  { %179 = vmatpush.msra.mxu2 %v99_v38 }
  0x38   :  { %180 = vmatpush.msra.mxu2 %v98_v39 }
  0x3a   :  { %181 = vmatpush.msra.mxu2 %v97_v40 }
  0x98   :  { %v139_v35 = vpop.f32.mrf.mxu0 }
  0x99   :  { %v140_v36 = vadd.f32 %v227_v34, %v139_v35 }
  0x9b   :  { %v142_v37 = vmax.f32 %v140_v36, 0.0 }
  0x9d   :  { %160 = vmatmul.f32.vlgmr.msra.gmra.mxu1 %v142_v37 }
 0x11a   :  { %v161_v42 = vpop.f32.mrf.mxu1 }
 0x11b   :  { %v162_v43 = vadd.f32 %v228_v41, %v161_v42 }
 0x11d   :  { %v164_v44 = vmax.f32 %v162_v43, 0.0 }
 0x11f   :  { %182 = vmatmul.f32.vlgmr.msra.gmra.mxu2 %v164_v44 }
 0x1a2   :  { %v183_v48 = vpop.f32.mrf.mxu2 }
 0x1a3   :  { %v184_v49 = vadd.f32 %v229_v47, %v183_v48 }
 0x1a5   :  { %v193_v50 = vsel %vm189_vm1, %v184_v49, 0.0  ;;  %v190_v51 = vsel %vm188_vm2, %v184_v49, -inf }
 0x1a6   :  { %194 = vadd.xlane.f32.xlu0 %v193_v50 }
 0x1ae   :  { %191 = vmax.xlane.f32.xlu0 %v190_v51 }
 0x219   :  { %v195_v52 = vpop.xlane.xlu0 %194 }
 0x21a   :  { %v196_v53 = vadd.f32 %v195_v52, %v184_v49 }
 0x221   :  { %v192_v54 = vpop.xlane.xlu0 %191 }
 0x222   :  { %v197_v55 = vsub.f32 %v196_v53, %v192_v54 }
 0x224   :  { %v198_v56 = vsel %vm188_vm2, %v197_v55, 0.0 }
 0x225   :  { %199 = vst [vmem:[#allocation10] sm:$0xff] %v198_v56 }
 0x226   :  { %210 = dma.vmem_to_hbm [thread:$0]  %s206_s3, 128, %s208_s11, [#allocation4]  }
 0x227   :  { %356 = dma.done.wait [#allocation4], 128  }
 0x228   :  { %357 = vsyncadd [#allocation4], 4294967168 }
 0x229   :  { %215 = vsyncpa [#allocation3], 1 }
 0x22a   :  { %216 = vsyncpa [#allocation6], 1 }
 0x22b   :  { %217 = vsyncpa [#allocation9], 1 }
 0x22c   :  { %218 = vsyncpa [#allocation4], 1 }

</bundles_post_ra>
